<compile_context>
chip_gen: v5e
topology: v5e:2x2
jax: 0.10.0
libtpu: 0.0.40
codegen_flags: <defaults>
</compile_context>

<pallas_src>
import jax
import jax.numpy as jnp
from jax.experimental import pallas as pl
from jax.experimental.pallas import tpu as pltpu

EPS = 10.0 ** (-9)
_LANES = 128
_MAX_BLOCK_ROWS = 2048   # (2048,128) f32 = 1 MiB; 2 inputs x 2 bufs + 2 acc ~= 6 MiB VMEM
_MAX_CORES = 2           # megacore split for v7x; harmless on single-TC chips


def _round_up(x, m):
    return ((x + m - 1) // m) * m


def weighted_categorical_cross_entropy(pred, true):
    """pred/true: (N, C, D, H, W), same layout the PyTorch module expects."""
    assert pred.shape == true.shape and pred.ndim == 5
    N, C, D, H, W = pred.shape
    total = N * C * D * H * W

    # Flatten to (rows, 128) with rows % 8 == 0.  When total % 1024 == 0 this
    # is a pure reshape (no HBM copy).  Otherwise a tiny (<1024-element) zero
    # tail is appended; zeros contribute exactly 0 to both sums (0*log(eps)=0),
    # so no in-kernel masking is needed for the padded tail.
    chunk = 8 * _LANES
    padded_total = _round_up(total, chunk)

    def _as_2d(x):
        xf = x.reshape(-1)                       # native dtype, no upcast here
        if padded_total != total:
            xf = jnp.pad(xf, (0, padded_total - total))
        return xf.reshape(padded_total // _LANES, _LANES)

    true_2d = _as_2d(true)
    pred_2d = _as_2d(pred)
    rows = padded_total // _LANES

    block_rows = min(_MAX_BLOCK_ROWS, rows)       # multiple of 8, <= rows
    total_blocks = -(-rows // block_rows)         # >= 1
    num_cores = min(_MAX_CORES, total_blocks)     # don't spin an all-masked core
    nblk = -(-total_blocks // num_cores)          # blocks handled per core
    grid = (num_cores, nblk)

    # Masking is only required when a block can contain garbage (partial last
    # block from Pallas' block padding) or re-read real data (clamped
    # out-of-range block from an uneven core split).  Decided at trace time.
    even_blocks = (rows % block_rows == 0)
    even_split = (num_cores * nblk == total_blocks)
    needs_mask = not (even_blocks and even_split)

    if even_split:
        def _in_map(c, i):
            return (c * nblk + i, 0)
    else:
        def _in_map(c, i):
            # Clamp so out-of-range (core, step) pairs re-read the last block;
            # the kernel masks their contribution to zero.
            return (jnp.minimum(c * nblk + i, total_blocks - 1), 0)

    def _kernel(true_ref, pred_ref, out_true_ref, out_ce_ref, acc_true, acc_ce):
        c = pl.program_id(0)
        i = pl.program_id(1)
        nsteps = pl.num_programs(1)

        @pl.when(i == 0)
        def _init():
            acc_true[...] = jnp.zeros_like(acc_true)
            acc_ce[...] = jnp.zeros_like(acc_ce)

        t = true_ref[...].astype(jnp.float32)
        p = pred_ref[...].astype(jnp.float32)

        if needs_mask:
            # Mask rows past the end of the array (partial last block / clamped
            # out-of-range blocks from the core split).  `rows` is static.
            b = c * nblk + i
            row_ids = b * block_rows + jax.lax.broadcasted_iota(
                jnp.int32, (block_rows, _LANES), 0)
            valid = row_ids < rows
            t = jnp.where(valid, t, 0.0)
            p = jnp.where(valid, p, 1.0)

        # Pure-VPU/EUP elementwise accumulation: no per-step cross-lane reduce
        # and no scalar loop-carried dependency.
        acc_true[...] += t
        acc_ce[...] += t * jnp.log(p + EPS)

        @pl.when(i == nsteps - 1)
        def _finalize():
            out_true_ref[...] = jnp.zeros_like(out_true_ref) + jnp.sum(acc_true[...])
            out_ce_ref[...] = jnp.zeros_like(out_ce_ref) + jnp.sum(acc_ce[...])

    bytes_accessed = (true_2d.size * true_2d.dtype.itemsize
                      + pred_2d.size * pred_2d.dtype.itemsize
                      + 2 * num_cores * 4)
    cost = pl.CostEstimate(flops=5 * total, transcendentals=total,
                           bytes_accessed=int(bytes_accessed))

    part_true, part_ce = pl.pallas_call(
        _kernel,
        out_shape=(
            jax.ShapeDtypeStruct((num_cores, 1, 1), jnp.float32),
            jax.ShapeDtypeStruct((num_cores, 1, 1), jnp.float32),
        ),
        grid_spec=pltpu.PrefetchScalarGridSpec(
            num_scalar_prefetch=0,
            grid=grid,
            in_specs=[
                pl.BlockSpec((block_rows, _LANES), _in_map),
                pl.BlockSpec((block_rows, _LANES), _in_map),
            ],
            out_specs=(
                pl.BlockSpec((1, 1, 1), lambda c, i: (c, 0, 0)),
                pl.BlockSpec((1, 1, 1), lambda c, i: (c, 0, 0)),
            ),
            scratch_shapes=[
                pltpu.VMEM((block_rows, _LANES), jnp.float32),
                pltpu.VMEM((block_rows, _LANES), jnp.float32),
            ],
        ),
        compiler_params=pltpu.CompilerParams(
            dimension_semantics=("parallel", "arbitrary")),
        cost_estimate=cost,
    )(true_2d, pred_2d)

    sum_true = jnp.sum(part_true)
    sum_ce = jnp.sum(part_ce)

    # Scalar epilogue (matches the PyTorch code line-by-line).
    result_f = jnp.log(sum_true)               # torch.log(torch.sum(true, dim=[0..4]))
    weight = result_f / jnp.sum(result_f)      # scalar / scalar -> 1.0
    # -sum over D, then mean over (N, H, W, C); the scalar 1/(weight+eps) factors out.
    loss = -(1.0 / (weight + EPS)) * sum_ce / (N * H * W * C)
    return loss


def _reference(pred, true):
    """Pure-JAX transliteration of the PyTorch forward for verification."""
    result = jnp.sum(true)
    result_f = jnp.log(result)
    weight = result_f / jnp.sum(result_f)
    t = jnp.transpose(true, (0, 2, 3, 4, 1))
    p = jnp.transpose(pred, (0, 2, 3, 4, 1))
    out = -1.0 * jnp.sum(1.0 / (weight + EPS) * t * jnp.log(p + EPS), axis=1)
    return out.mean()


if __name__ == "__main__":
    key = jax.random.PRNGKey(0)
    k1, k2 = jax.random.split(key)
    N, C, D, H, W = 2, 4, 8, 8, 16

    logits = jax.random.normal(k1, (N, C, D, H, W), dtype=jnp.float32)
    pred = jax.nn.softmax(logits, axis=1)                        # class probabilities
    labels = jax.random.randint(k2, (N, D, H, W), 0, C)
    true = jax.nn.one_hot(labels, C, axis=1, dtype=jnp.float32)  # one-hot, NCDHW

    loss = weighted_categorical_cross_entropy(pred, true)
    loss = jax.block_until_ready(loss)

    ref = _reference(pred, true)
    assert jnp.allclose(loss, ref, rtol=1e-5, atol=1e-5), (loss, ref)
    print("KERNEL_OK")
</pallas_src>

<mosaic_0001>
module attributes {stable_mosaic.version = 11 : i64} {
  func.func @_kernel(%arg0: i32, %arg1: i32, %arg2: memref<64x128xf32, #tpu.memory_space<vmem>>, %arg3: memref<64x128xf32, #tpu.memory_space<vmem>>, %arg4: memref<1x1x1xf32, #tpu.memory_space<vmem>>, %arg5: memref<1x1x1xf32, #tpu.memory_space<vmem>>, %arg6: memref<64x128xf32, #tpu.memory_space<vmem>>, %arg7: memref<64x128xf32, #tpu.memory_space<vmem>>) attributes {dimension_semantics = [#tpu.dimension_semantics<parallel>, #tpu.dimension_semantics<arbitrary>], iteration_bounds = array<i64: 1, 1>, scalar_prefetch = 0 : i64, scratch_operands = 2 : i64, tpu.core_type = #tpu.core_type<tc>, window_params = [{transform_indices = @transform_0, window_bounds = array<i64: 64, 128>}, {transform_indices = @transform_1, window_bounds = array<i64: 64, 128>}, {transform_indices = @transform_2, window_bounds = array<i64: 1, 1, 1>}, {transform_indices = @transform_3, window_bounds = array<i64: 1, 1, 1>}]} {
    %c0_i32 = arith.constant 0 : i32
    %0 = arith.cmpi eq, %arg1, %c0_i32 : i32
    %1 = arith.extui %0 : i1 to i32
    %c0_i32_0 = arith.constant 0 : i32
    %2 = arith.cmpi ne, %1, %c0_i32_0 : i32
    scf.if %2 {
      %cst_14 = arith.constant 0.000000e+00 : f32
      %18 = vector.broadcast %cst_14 : f32 to vector<64x128xf32>
      %c0_15 = arith.constant 0 : index
      %c0_16 = arith.constant 0 : index
      %19 = vector.load %arg6[%c0_15, %c0_16] : memref<64x128xf32, #tpu.memory_space<vmem>>, vector<64x128xf32>
      tpu.vector_store %arg6[%c0_15, %c0_16], %18 {strides = array<i32>} : memref<64x128xf32, #tpu.memory_space<vmem>>, vector<64x128xf32>,
      %cst_17 = arith.constant 0.000000e+00 : f32
      %20 = vector.broadcast %cst_17 : f32 to vector<64x128xf32>
      %c0_18 = arith.constant 0 : index
      %c0_19 = arith.constant 0 : index
      %21 = vector.load %arg7[%c0_18, %c0_19] : memref<64x128xf32, #tpu.memory_space<vmem>>, vector<64x128xf32>
      tpu.vector_store %arg7[%c0_18, %c0_19], %20 {strides = array<i32>} : memref<64x128xf32, #tpu.memory_space<vmem>>, vector<64x128xf32>,
    } else {
    }
    %c0 = arith.constant 0 : index
    %c0_1 = arith.constant 0 : index
    %3 = vector.load %arg2[%c0, %c0_1] : memref<64x128xf32, #tpu.memory_space<vmem>>, vector<64x128xf32>
    %c0_2 = arith.constant 0 : index
    %c0_3 = arith.constant 0 : index
    %4 = vector.load %arg3[%c0_2, %c0_3] : memref<64x128xf32, #tpu.memory_space<vmem>>, vector<64x128xf32>
    %c0_4 = arith.constant 0 : index
    %c0_5 = arith.constant 0 : index
    %5 = vector.load %arg6[%c0_4, %c0_5] : memref<64x128xf32, #tpu.memory_space<vmem>>, vector<64x128xf32>
    %6 = arith.addf %5, %3 : vector<64x128xf32>
    %c0_6 = arith.constant 0 : index
    %c0_7 = arith.constant 0 : index
    %7 = vector.load %arg6[%c0_6, %c0_7] : memref<64x128xf32, #tpu.memory_space<vmem>>, vector<64x128xf32>
    tpu.vector_store %arg6[%c0_6, %c0_7], %6 {strides = array<i32>} : memref<64x128xf32, #tpu.memory_space<vmem>>, vector<64x128xf32>,
    %c0_8 = arith.constant 0 : index
    %c0_9 = arith.constant 0 : index
    %8 = vector.load %arg7[%c0_8, %c0_9] : memref<64x128xf32, #tpu.memory_space<vmem>>, vector<64x128xf32>
    %cst = arith.constant 9.99999971E-10 : f32
    %9 = vector.broadcast %cst : f32 to vector<64x128xf32>
    %10 = arith.addf %4, %9 : vector<64x128xf32>
    %11 = math.log %10 : vector<64x128xf32>
    %12 = arith.mulf %3, %11 : vector<64x128xf32>
    %13 = arith.addf %8, %12 : vector<64x128xf32>
    %c0_10 = arith.constant 0 : index
    %c0_11 = arith.constant 0 : index
    %14 = vector.load %arg7[%c0_10, %c0_11] : memref<64x128xf32, #tpu.memory_space<vmem>>, vector<64x128xf32>
    tpu.vector_store %arg7[%c0_10, %c0_11], %13 {strides = array<i32>} : memref<64x128xf32, #tpu.memory_space<vmem>>, vector<64x128xf32>,
    %c0_i32_12 = arith.constant 0 : i32
    %15 = arith.cmpi eq, %arg1, %c0_i32_12 : i32
    %16 = arith.extui %15 : i1 to i32
    %c0_i32_13 = arith.constant 0 : i32
    %17 = arith.cmpi ne, %16, %c0_i32_13 : i32
    scf.if %17 {
      %cst_14 = arith.constant 0.000000e+00 : f32
      %18 = vector.broadcast %cst_14 : f32 to vector<1x1x1xf32>
      %c0_15 = arith.constant 0 : index
      %c0_16 = arith.constant 0 : index
      %19 = vector.load %arg6[%c0_15, %c0_16] : memref<64x128xf32, #tpu.memory_space<vmem>>, vector<64x128xf32>
      %20 = vector.shape_cast %19 : vector<64x128xf32> to vector<1x64x128xf32>
      %cst_17 = arith.constant dense<0.000000e+00> : vector<1xf32>
      %21 = vector.multi_reduction <add>, %20, %cst_17 [1, 2] : vector<1x64x128xf32> to vector<1xf32>
      %22 = vector.shape_cast %21 : vector<1xf32> to vector<1x1x1xf32>
      %23 = vector.extract %22[0, 0, 0] : f32 from vector<1x1x1xf32>
      %24 = vector.broadcast %23 : f32 to vector<1x1x1xf32>
      %25 = arith.addf %18, %24 : vector<1x1x1xf32>
      %c0_18 = arith.constant 0 : index
      %c0_19 = arith.constant 0 : index
      %c0_20 = arith.constant 0 : index
      %26 = vector.load %arg4[%c0_18, %c0_19, %c0_20] : memref<1x1x1xf32, #tpu.memory_space<vmem>>, vector<1x1x1xf32>
      tpu.vector_store %arg4[%c0_18, %c0_19, %c0_20], %25 {strides = array<i32>} : memref<1x1x1xf32, #tpu.memory_space<vmem>>, vector<1x1x1xf32>,
      %cst_21 = arith.constant 0.000000e+00 : f32
      %27 = vector.broadcast %cst_21 : f32 to vector<1x1x1xf32>
      %c0_22 = arith.constant 0 : index
      %c0_23 = arith.constant 0 : index
      %28 = vector.load %arg7[%c0_22, %c0_23] : memref<64x128xf32, #tpu.memory_space<vmem>>, vector<64x128xf32>
      %29 = vector.shape_cast %28 : vector<64x128xf32> to vector<1x64x128xf32>
      %cst_24 = arith.constant dense<0.000000e+00> : vector<1xf32>
      %30 = vector.multi_reduction <add>, %29, %cst_24 [1, 2] : vector<1x64x128xf32> to vector<1xf32>
      %31 = vector.shape_cast %30 : vector<1xf32> to vector<1x1x1xf32>
      %32 = vector.extract %31[0, 0, 0] : f32 from vector<1x1x1xf32>
      %33 = vector.broadcast %32 : f32 to vector<1x1x1xf32>
      %34 = arith.addf %27, %33 : vector<1x1x1xf32>
      %c0_25 = arith.constant 0 : index
      %c0_26 = arith.constant 0 : index
      %c0_27 = arith.constant 0 : index
      %35 = vector.load %arg5[%c0_25, %c0_26, %c0_27] : memref<1x1x1xf32, #tpu.memory_space<vmem>>, vector<1x1x1xf32>
      tpu.vector_store %arg5[%c0_25, %c0_26, %c0_27], %34 {strides = array<i32>} : memref<1x1x1xf32, #tpu.memory_space<vmem>>, vector<1x1x1xf32>,
    } else {
    }
    return
  }
  func.func @transform_0(%arg0: i32, %arg1: i32) -> (i32, i32) {
    %c1_i32 = arith.constant 1 : i32
    %0 = arith.muli %arg0, %c1_i32 : i32
    %1 = arith.addi %0, %arg1 : i32
    %c0_i32 = arith.constant 0 : i32
    %c0_i32_0 = arith.constant 0 : i32
    return %1, %c0_i32 : i32, i32
  }
  func.func @transform_1(%arg0: i32, %arg1: i32) -> (i32, i32) {
    %c1_i32 = arith.constant 1 : i32
    %0 = arith.muli %arg0, %c1_i32 : i32
    %1 = arith.addi %0, %arg1 : i32
    %c0_i32 = arith.constant 0 : i32
    %c0_i32_0 = arith.constant 0 : i32
    return %1, %c0_i32 : i32, i32
  }
  func.func @transform_2(%arg0: i32, %arg1: i32) -> (i32, i32, i32) {
    %c0_i32 = arith.constant 0 : i32
    %c0_i32_0 = arith.constant 0 : i32
    %c0_i32_1 = arith.constant 0 : i32
    return %arg0, %c0_i32, %c0_i32_0 : i32, i32, i32
  }
  func.func @transform_3(%arg0: i32, %arg1: i32) -> (i32, i32, i32) {
    %c0_i32 = arith.constant 0 : i32
    %c0_i32_0 = arith.constant 0 : i32
    %c0_i32_1 = arith.constant 0 : i32
    return %arg0, %c0_i32, %c0_i32_0 : i32, i32, i32
  }
}

</mosaic_0001>

<bundles_post_ra>
// kernel: tpu_custom_call.1
= control target key start
LH: loop header
LB: loop body
LE: loop exit
PB: predicated region body
PF: predicated region fallthrough
CT: control target
= control target key end

     0   :  { %9 = vsyncpa [#allocation5], 0  ;;  %s435_s0 = inlined_call_operand.hbm [shape: f32[64,128], index: 0, kind: input, shape index: {}]   ;;  %s436_s1 = inlined_call_operand.hbm [shape: f32[64,128], index: 1, kind: input, shape index: {}]   ;;  %s437_s2 = inlined_call_operand.hbm [shape: f32[1,1,1], index: 2, kind: output, shape index: {0}]   ;;  %s438_s3 = inlined_call_operand.hbm [shape: f32[1,1,1], index: 3, kind: output, shape index: {1}]  }
   0x1   :  { %10 = vsyncpa [#allocation8], 0 }
   0x2   :  { %11 = vsyncpa [#allocation6], 0 }
   0x3   :  { %12 = vsyncpa [#allocation11], 0  ;;  %s21_s14 = sshll.u32 %s435_s0, 4  ;;  %s397_s15 = smov [#allocation4]   ;;  %s22_s14 = int_to_ptr.hbm [resolvable:$true] %s21_s14 }
   0x4   :  { %s23_s16 = sshll.u32 %s397_s15, 4  ;;  %s38_s19 = sshll.u32 %s436_s1, 4  ;;  %s24_s16 = int_to_ptr.vmem [resolvable:$true] %s23_s16  ;;  %s39_s19 = int_to_ptr.hbm [resolvable:$true] %s38_s19 }
   0x5   :  { %s398_s20 = smov 128   ;;  %s399_s21 = smov 8  }
   0x6   :  { %29 = dma.hbm_to_vmem [thread:$0]  %s22_s14, 1024, %s24_s16, [#allocation5], %s398_s20, %s398_s20, %s399_s21  }
   0x7   :  { %s400_s22 = smov [#allocation7]  }
   0x8   :  { %s40_s23 = sshll.u32 %s400_s22, 4  ;;  %s41_s23 = int_to_ptr.vmem [resolvable:$true] %s40_s23 }
   0x9   :  { %46 = dma.hbm_to_vmem [thread:$0]  %s39_s19, 1024, %s41_s23, [#allocation8], %s398_s20, %s398_s20, %s399_s21  }
   0xa   :  { %389 = dma.done.wait [#allocation5], 1024  }
   0xb   :  { %390 = vsyncadd [#allocation5], 4294966272 }
   0xc   :  { %391 = dma.done.wait [#allocation8], 1024  }
   0xd   :  { %392 = vsyncadd [#allocation8], 4294966272  ;;  %v79_v0 = vld [vmem:[#allocation4] sm:$0xff]  ;;  %v80_v1 = vld [vmem:[#allocation4 + $0x8] sm:$0xff]  ;;  %s401_s0 = smov [#allocation9]   ;;  %s240_s26 = sshll.u32 %s437_s2, 4  ;;  %s241_s26 = int_to_ptr.hbm [resolvable:$true] %s240_s26 }
   0xe   :  { %v81_v2 = vld [vmem:[#allocation4 + $0x10] sm:$0xff]  ;;  %v186_v3 = vadd.f32 %v80_v1, %v79_v0  ;;  %v82_v4 = vld [vmem:[#allocation4 + $0x18] sm:$0xff]  ;;  %v83_v5 = vld [vmem:[#allocation4 + $0x20] sm:$0xff]  ;;  %s238_s1 = sshll.u32 %s401_s0, 4  ;;  %vm204_vm0 = vcmask 0   ;;  %s402_s28 = smov [#allocation10]   ;;  %s239_s1 = int_to_ptr.vmem [resolvable:$true] %s238_s1 }
   0xf   :  { %v87_v6 = vld [vmem:[#allocation7] sm:$0xff]  ;;  %v88_v7 = vld [vmem:[#allocation7 + $0x8] sm:$0xff]  ;;  %v89_v8 = vld [vmem:[#allocation7 + $0x10] sm:$0xff]  ;;  %s249_s29 = sshll.u32 %s402_s28, 4  ;;  %s251_s5 = sshll.u32 %s438_s3, 4  ;;  %s250_s29 = int_to_ptr.vmem [resolvable:$true] %s249_s29  ;;  %s252_s5 = int_to_ptr.hbm [resolvable:$true] %s251_s5 }
  0x10   :  { %v90_v9 = vld [vmem:[#allocation7 + $0x18] sm:$0xff]  ;;  %v127_v10 = vadd.f32 1e-09, %v87_v6  ;;  %v187_v11 = vadd.f32 %v186_v3, %v81_v2  ;;  %v91_v12 = vld [vmem:[#allocation7 + $0x20] sm:$0xff]  ;;  %v92_v13 = vld [vmem:[#allocation7 + $0x28] sm:$0xff] }
  0x11   :  { %v93_v14 = vld [vmem:[#allocation7 + $0x30] sm:$0xff]  ;;  %v128_v15 = vadd.f32 1e-09, %v88_v7  ;;  %v94_v16 = vld [vmem:[#allocation7 + $0x38] sm:$0xff]  ;;  %v129_v17 = vadd.f32 1e-09, %v89_v8 }
  0x12   :  { %v130_v18 = vadd.f32 1e-09, %v90_v9  ;;  %277 = vlog2.f32 %v127_v10  ;;  %v188_v19 = vadd.f32 %v187_v11, %v82_v4  ;;  %v84_v20 = vld [vmem:[#allocation4 + $0x28] sm:$0xff]  ;;  %v131_v21 = vadd.f32 1e-09, %v91_v12  ;;  %v85_v25 = vld [vmem:[#allocation4 + $0x30] sm:$0xff] }
  0x13   :  { %v132_v22 = vadd.f32 1e-09, %v92_v13  ;;  %279 = vlog2.f32 %v128_v15  ;;  %v133_v23 = vadd.f32 1e-09, %v93_v14  ;;  %v134_v26 = vadd.f32 1e-09, %v94_v16 }
  0x14   :  { %281 = vlog2.f32 %v129_v17  ;;  %v189_v24 = vadd.f32 %v188_v19, %v83_v5  ;;  %v86_v28 = vld [vmem:[#allocation4 + $0x38] sm:$0xff] }
  0x15   :  { %283 = vlog2.f32 %v130_v18 }
  0x16   :  { %285 = vlog2.f32 %v131_v21  ;;  %v190_v27 = vadd.f32 %v189_v24, %v84_v20 }
  0x17   :  { %287 = vlog2.f32 %v132_v22 }
  0x18   :  { %v278_v29 = vpop.eup %277  ;;  %289 = vlog2.f32 %v133_v23  ;;  %v191_v30 = vadd.f32 %v190_v27, %v85_v25 }
  0x19   :  { %v280_v31 = vpop.eup %279  ;;  %v136_v32 = vmul.f32 0.6931472, %v278_v29  ;;  %291 = vlog2.f32 %v134_v26 }
  0x1a   :  { %v282_v33 = vpop.eup %281  ;;  %v138_v34 = vmul.f32 0.6931472, %v280_v31  ;;  %v192_v35 = vadd.f32 %v191_v30, %v86_v28 }
  0x1b   :  { %v284_v36 = vpop.eup %283  ;;  %v140_v37 = vmul.f32 0.6931472, %v282_v33  ;;  %v151_v38 = vmul.f32 %v136_v32, %v79_v0 }
  0x1c   :  { %v286_v39 = vpop.eup %285  ;;  %v142_v40 = vmul.f32 0.6931472, %v284_v36  ;;  %v152_v41 = vmul.f32 %v138_v34, %v80_v1  ;;  %193 = vadd.xlane.f32.xlu0 %v192_v35 }
  0x1d   :  { %v288_v42 = vpop.eup %287  ;;  %v144_v43 = vmul.f32 0.6931472, %v286_v39  ;;  %v153_v44 = vmul.f32 %v140_v37, %v81_v2 }
  0x1e   :  { %v290_v45 = vpop.eup %289  ;;  %v146_v46 = vmul.f32 0.6931472, %v288_v42  ;;  %v154_v47 = vmul.f32 %v142_v40, %v82_v4  ;;  %v214_v48 = vadd.f32 %v152_v41, %v151_v38 }
  0x1f   :  { %v292_v49 = vpop.eup %291  ;;  %v148_v50 = vmul.f32 0.6931472, %v290_v45  ;;  %v155_v51 = vmul.f32 %v144_v43, %v83_v5 }
  0x20   :  { %v215_v52 = vadd.f32 %v214_v48, %v153_v44  ;;  %v150_v53 = vmul.f32 0.6931472, %v292_v49  ;;  %v156_v54 = vmul.f32 %v146_v46, %v84_v20 }
  0x21   :  { %v157_v56 = vmul.f32 %v148_v50, %v85_v25 }
  0x22   :  { %v216_v55 = vadd.f32 %v215_v52, %v154_v47  ;;  %v158_v58 = vmul.f32 %v150_v53, %v86_v28 }
  0x24   :  { %v217_v57 = vadd.f32 %v216_v55, %v155_v51 }
  0x26   :  { %v218_v59 = vadd.f32 %v217_v57, %v156_v54 }
  0x28   :  { %v219_v60 = vadd.f32 %v218_v59, %v157_v56 }
  0x2a   :  { %v220_v61 = vadd.f32 %v219_v60, %v158_v58 }
  0x2c   :  { %221 = vadd.xlane.f32.xlu0 %v220_v61 }
  0x8f   :  { %v194_v62 = vpop.xlane.xlu0 %193 }
  0x90   :  { %v195_v63 = vrot.slane %v194_v62, 4 }
  0x92   :  { %v196_v0 = vadd.f32 %v195_v63, %v194_v62 }
  0x94   :  { %v197_v1 = vrot.slane %v196_v0, 2 }
  0x96   :  { %v198_v2 = vadd.f32 %v197_v1, %v196_v0 }
  0x98   :  { %v199_v3 = vrot.slane %v198_v2, 1 }
  0x9a   :  { %v200_v4 = vadd.f32 %v199_v3, %v198_v2 }
  0x9c   :  { %267 = vpush %v200_v4 }
  0x9f   :  { %v222_v5 = vpop.xlane.xlu0 %221 }
  0xa0   :  { %v223_v6 = vrot.slane %v222_v5, 4 }
  0xa2   :  { %v224_v7 = vadd.f32 %v223_v6, %v222_v5 }
  0xa4   :  { %v225_v8 = vrot.slane %v224_v7, 2 }
  0xa6   :  { %v226_v9 = vadd.f32 %v225_v8, %v224_v7 }
  0xa8   :  { %v227_v10 = vrot.slane %v226_v9, 1 }
  0xaa   :  { %v228_v11 = vadd.f32 %v227_v10, %v226_v9 }
  0xac   :  { %269 = vpush %v228_v11 }
  0xcd   :  { %s268_s27 = spop %267 }
  0xce   :  { %v202_v12 = vstv %s268_s27 }
  0xcf   :  { %205 = vst.msk [vmem:[#allocation9] sm:$0x1] %vm204_vm0, %v202_v12 }
  0xd0   :  { %243 = dma.vmem_to_hbm [thread:$0]  %s239_s1, 16, %s241_s26, [#allocation6]  }
  0xdd   :  { %s270_s6 = spop %269 }
  0xde   :  { %v230_v13 = vstv %s270_s6 }
  0xdf   :  { %232 = vst.msk [vmem:[#allocation10] sm:$0x1] %vm204_vm0, %v230_v13 }
  0xe0   :  { %254 = dma.vmem_to_hbm [thread:$0]  %s250_s29, 16, %s252_s5, [#allocation11]  }
  0xe1   :  { %393 = dma.done.wait [#allocation6], 16  }
  0xe2   :  { %394 = vsyncadd [#allocation6], 4294967280 }
  0xe3   :  { %395 = dma.done.wait [#allocation11], 16  }
  0xe4   :  { %396 = vsyncadd [#allocation11], 4294967280 }
  0xe5   :  { %263 = vsyncpa [#allocation5], 1 }
  0xe6   :  { %264 = vsyncpa [#allocation8], 1 }
  0xe7   :  { %265 = vsyncpa [#allocation6], 1 }
  0xe8   :  { %266 = vsyncpa [#allocation11], 1 }

</bundles_post_ra>
